<compile_context>
chip_gen: v7x
topology: tpu7x:2x2x1
jax: 0.10.0
libtpu: 0.0.40
codegen_flags: <defaults>
</compile_context>

<pallas_src>
import functools
import math

import jax
import jax.numpy as jnp
from jax import lax
from jax.experimental import pallas as pl
from jax.experimental.pallas import tpu as pltpu

_MIB = 1024 * 1024


# ---------------------------------------------------------------------------
# Tiling / VMEM helpers
# ---------------------------------------------------------------------------
def _sublane_multiple(dtype):
    # Sub-32-bit dtypes pack along sublanes: bf16 tiles want multiples of 16,
    # 1-byte dtypes multiples of 32.
    return {4: 8, 2: 16, 1: 32}.get(jnp.dtype(dtype).itemsize, 8)


def _pick_tile(dim, target, dtype):
    """Largest t <= target with dim % t == 0 and (t == dim or t % sublane == 0).

    Falls back to the full dimension for awkward sizes (the vmem_limit /
    tile-shrink logic in the wrapper then keeps the working set in budget).
    """
    sub = _sublane_multiple(dtype)
    if dim <= target:
        return dim
    for t in range(min(target, dim), sub - 1, -1):
        if dim % t == 0 and t % sub == 0:
            return t
    return dim


def _vmem_capacity_bytes():
    try:
        return int(pltpu.get_tpu_info().vmem_capacity_bytes)
    except Exception:
        return 64 * _MIB  # conservative default: v7x has 64 MiB per TensorCore


def _compiler_params(semantics, needed_bytes, capacity):
    limit = int(needed_bytes * 1.3) + 4 * _MIB
    limit = max(limit, 32 * _MIB)
    limit = min(limit, capacity - 2 * _MIB)
    limit = max(limit, 16 * _MIB)
    return pltpu.CompilerParams(dimension_semantics=semantics,
                                vmem_limit_bytes=limit)


def _attn_path_bytes(tq, Lk, Dk, Dv, in_item, out_item):
    io = 2 * in_item * (tq * Dk + Lk * (Dk + Dv))   # double-buffered inputs
    io += 2 * out_item * (tq * Dv + tq * Lk)        # double-buffered outputs
    tmp = 4 * 4 * tq * Lk + 4 * tq * Dv             # f32 softmax temporaries
    return io + tmp


def _flash_path_bytes(tq, tk, Dk, Dv, in_item, out_item, cd_item):
    io = 2 * in_item * (tq * Dk + tk * (Dk + Dv))
    io += 2 * out_item * tq * Dv
    scr = 4 * (2 * tq + tq * Dv) + cd_item * tq * Dk
    tmp = 3 * 4 * tq * tk                           # f32 scores/p temporaries
    return io + scr + tmp


# ---------------------------------------------------------------------------
# Kernel 1: module-exact path (returns context AND attention probabilities).
# K/V for a (batch, head) stay whole in VMEM; only Lq is tiled.
# ---------------------------------------------------------------------------
def _sdpa_attn_kernel(q_ref, k_ref, v_ref, ctx_ref, attn_ref, *,
                      scale, compute_dtype):
    q = q_ref[0, 0]            # (tq, Dk) input dtype
    k = k_ref[0, 0]            # (Lk, Dk)
    v = v_ref[0, 0]            # (Lk, Dv)

    # Fold 1/sqrt(d_k) into Q, then feed the MXU in the compute dtype
    # (bf16 for f32 inputs) with f32 accumulation.
    qs = (q * scale).astype(compute_dtype)
    scores = lax.dot_general(
        qs, k.astype(compute_dtype),
        dimension_numbers=(((1,), (1,)), ((), ())),
        preferred_element_type=jnp.float32)                      # (tq, Lk) f32

    # Numerically-stable softmax along the key axis (f32 math).  Exact divide:
    # the returned attention rows must sum to 1 (approx reciprocal would not).
    m = jnp.max(scores, axis=-1, keepdims=True)
    e = jnp.exp(scores - m)
    denom = jnp.sum(e, axis=-1, keepdims=True)
    p = e / denom                                                # (tq, Lk) f32

    # Single cast pass to the MXU dtype for p @ V.
    p_mm = p.astype(compute_dtype)
    ctx = lax.dot_general(
        p_mm, v.astype(compute_dtype),
        dimension_numbers=(((1,), (0,)), ((), ())),
        preferred_element_type=jnp.float32)                      # (tq, Dv) f32

    ctx_ref[0, 0] = ctx.astype(ctx_ref.dtype)
    if attn_ref.dtype == jnp.dtype(compute_dtype):
        attn_ref[0, 0] = p_mm            # reuse the already-cast tile
    else:
        attn_ref[0, 0] = p.astype(attn_ref.dtype)   # no-op cast for f32 attn


# ---------------------------------------------------------------------------
# Kernel 2: flash-style path (context only, online softmax over Lk tiles).
# ---------------------------------------------------------------------------
def _sdpa_flash_kernel(q_ref, k_ref, v_ref, ctx_ref,
                       qs_sc, m_sc, l_sc, acc_sc, *, scale):
    kv = pl.program_id(3)

    @pl.when(kv == 0)
    def _():
        # Hoist q * scale (and the cast to the MXU dtype) out of the kv loop:
        # the Q block is constant across the innermost axis.
        qs_sc[...] = (q_ref[0, 0] * scale).astype(qs_sc.dtype)
        m_sc[...] = jnp.full_like(m_sc, -jnp.inf)
        l_sc[...] = jnp.zeros_like(l_sc)
        acc_sc[...] = jnp.zeros_like(acc_sc)

    compute_dtype = qs_sc.dtype
    k = k_ref[0, 0].astype(compute_dtype)            # (tk, Dk)
    v = v_ref[0, 0].astype(compute_dtype)            # (tk, Dv)

    s = lax.dot_general(
        qs_sc[...], k,
        dimension_numbers=(((1,), (1,)), ((), ())),
        preferred_element_type=jnp.float32)                      # (tq, tk) f32

    m_prev = m_sc[...]
    m_new = jnp.maximum(m_prev, jnp.max(s, axis=-1, keepdims=True))
    alpha = jnp.exp(m_prev - m_new)
    p = jnp.exp(s - m_new)
    l_sc[...] = alpha * l_sc[...] + jnp.sum(p, axis=-1, keepdims=True)
    acc_sc[...] = alpha * acc_sc[...] + lax.dot_general(
        p.astype(compute_dtype), v,
        dimension_numbers=(((1,), (0,)), ((), ())),
        preferred_element_type=jnp.float32)
    m_sc[...] = m_new

    @pl.when(kv == pl.num_programs(3) - 1)
    def _():
        inv_l = pl.reciprocal(l_sc[...], approx=True)   # EUP slot, context only
        ctx_ref[0, 0] = (acc_sc[...] * inv_l).astype(ctx_ref.dtype)


# ---------------------------------------------------------------------------
# Wrapper
# ---------------------------------------------------------------------------
def scaled_dot_product_attention(Q, K, V, d_k, *, return_attn=True,
                                 q_tile=None, k_tile=None,
                                 use_bf16_matmul=True):
    """Pallas equivalent of ScaledDotProductAttention.forward.

    Q: [B, H, Lq, d_k], K: [B, H, Lk, d_k], V: [B, H, Lk, d_v]
    return_attn=True  -> (context [B,H,Lq,d_v], attn [B,H,Lq,Lk]) (module semantics)
    return_attn=False -> context only (flash-style, no O(Lq*Lk) writeback)
    use_bf16_matmul   -> feed bf16 operands to the MXU for f32 inputs
                         (f32 accumulation; small, documented numerics delta).
    """
    B, H, Lq, Dk = Q.shape
    _, _, Lk, _ = K.shape
    Dv = V.shape[-1]
    scale = 1.0 / math.sqrt(d_k)     # d_k only sets the scale, as in PyTorch

    in_dtype = Q.dtype
    compute_dtype = (jnp.bfloat16
                     if (use_bf16_matmul and in_dtype == jnp.float32)
                     else in_dtype)
    in_item = jnp.dtype(in_dtype).itemsize
    out_item = in_item
    cd_item = jnp.dtype(compute_dtype).itemsize
    capacity = _vmem_capacity_bytes()
    budget = max(capacity - 8 * _MIB, 8 * _MIB)
    sub = _sublane_multiple(in_dtype)

    if return_attn:
        tq = _pick_tile(Lq, q_tile if q_tile is not None else 256, in_dtype)
        # Generation-aware shrink: a working set that fits v6e/v5e's 128 MiB
        # VMEM will not necessarily fit v7x's 64 MiB.
        while (_attn_path_bytes(tq, Lk, Dk, Dv, in_item, out_item) > budget
               and tq > sub):
            new_tq = _pick_tile(Lq, max(sub, tq // 2), in_dtype)
            if new_tq >= tq:
                break
            tq = new_tq
        # Keep at least two parallel grid steps so both v7x TCs get work.
        if B * H * (Lq // tq) < 2 and tq > sub:
            new_tq = _pick_tile(Lq, max(sub, tq // 2), in_dtype)
            if new_tq < tq:
                tq = new_tq

        needed = _attn_path_bytes(tq, Lk, Dk, Dv, in_item, out_item)
        kernel = functools.partial(_sdpa_attn_kernel, scale=scale,
                                   compute_dtype=compute_dtype)
        context, attn = pl.pallas_call(
            kernel,
            out_shape=(
                jax.ShapeDtypeStruct((B, H, Lq, Dv), Q.dtype),
                jax.ShapeDtypeStruct((B, H, Lq, Lk), Q.dtype),
            ),
            grid_spec=pltpu.PrefetchScalarGridSpec(
                num_scalar_prefetch=0,
                grid=(B, H, Lq // tq),
                in_specs=[
                    pl.BlockSpec((1, 1, tq, Dk), lambda b, h, i: (b, h, i, 0)),
                    # TODO(synk): on VMEM-tight v7x configs, K/V could drop to
                    # pipeline_mode=pl.Buffered(1) (block constant within a
                    # (b, h)); left at default depth for portability.
                    pl.BlockSpec((1, 1, Lk, Dk), lambda b, h, i: (b, h, 0, 0)),
                    pl.BlockSpec((1, 1, Lk, Dv), lambda b, h, i: (b, h, 0, 0)),
                ],
                out_specs=[
                    pl.BlockSpec((1, 1, tq, Dv), lambda b, h, i: (b, h, i, 0)),
                    pl.BlockSpec((1, 1, tq, Lk), lambda b, h, i: (b, h, i, 0)),
                ],
            ),
            compiler_params=_compiler_params(
                ("parallel", "parallel", "parallel"), needed, capacity),
        )(Q, K, V)
        return context, attn

    # ----------------------------- flash path -----------------------------
    tq = _pick_tile(Lq, q_tile if q_tile is not None else 512, in_dtype)
    tk = _pick_tile(Lk, k_tile if k_tile is not None else 1024, in_dtype)
    while (_flash_path_bytes(tq, tk, Dk, Dv, in_item, out_item, cd_item) > budget
           and (tq > sub or tk > sub)):
        if tk >= tq and tk > sub:
            new_tk = _pick_tile(Lk, max(sub, tk // 2), in_dtype)
            if new_tk < tk:
                tk = new_tk
                continue
        if tq > sub:
            new_tq = _pick_tile(Lq, max(sub, tq // 2), in_dtype)
            if new_tq < tq:
                tq = new_tq
                continue
        break
    if B * H * (Lq // tq) < 2 and tq > sub:
        new_tq = _pick_tile(Lq, max(sub, tq // 2), in_dtype)
        if new_tq < tq:
            tq = new_tq

    needed = _flash_path_bytes(tq, tk, Dk, Dv, in_item, out_item, cd_item)
    kernel = functools.partial(_sdpa_flash_kernel, scale=scale)
    context = pl.pallas_call(
        kernel,
        out_shape=jax.ShapeDtypeStruct((B, H, Lq, Dv), Q.dtype),
        grid_spec=pltpu.PrefetchScalarGridSpec(
            num_scalar_prefetch=0,
            grid=(B, H, Lq // tq, Lk // tk),
            in_specs=[
                pl.BlockSpec((1, 1, tq, Dk), lambda b, h, i, j: (b, h, i, 0)),
                # TODO(synk): sweep pipeline_mode=pl.Buffered(3) on K/V for
                # long sequences on v5e/v6e.
                pl.BlockSpec((1, 1, tk, Dk), lambda b, h, i, j: (b, h, j, 0)),
                pl.BlockSpec((1, 1, tk, Dv), lambda b, h, i, j: (b, h, j, 0)),
            ],
            out_specs=pl.BlockSpec((1, 1, tq, Dv),
                                   lambda b, h, i, j: (b, h, i, 0)),
            scratch_shapes=[
                pltpu.VMEM((tq, Dk), compute_dtype),  # scaled Q (hoisted)
                pltpu.VMEM((tq, 1), jnp.float32),     # running max
                pltpu.VMEM((tq, 1), jnp.float32),     # running denominator
                pltpu.VMEM((tq, Dv), jnp.float32),    # output accumulator
            ],
        ),
        compiler_params=_compiler_params(
            ("parallel", "parallel", "parallel", "arbitrary"),
            needed, capacity),
    )(Q, K, V)
    return context


# ---------------------------------------------------------------------------
# Reference + tests
# ---------------------------------------------------------------------------
def _reference(Q, K, V, d_k):
    Qf, Kf, Vf = (x.astype(jnp.float32) for x in (Q, K, V))
    scores = jnp.einsum("bhqd,bhkd->bhqk", Qf, Kf) / jnp.sqrt(jnp.float32(d_k))
    attn = jax.nn.softmax(scores, axis=-1)
    context = jnp.einsum("bhqk,bhkd->bhqd", attn, Vf)
    return context, attn


if __name__ == "__main__":
    key = jax.random.PRNGKey(0)
    k1, k2, k3, k4, k5, k6 = jax.random.split(key, 6)

    # --- Test 1: module-exact semantics (context AND attn), f32 MXU path ---
    B, H, Lq, Lk, d_k, d_v = 2, 4, 8, 8, 32, 32
    Q = jax.random.normal(k1, (B, H, Lq, d_k), dtype=jnp.float32)
    K = jax.random.normal(k2, (B, H, Lk, d_k), dtype=jnp.float32)
    V = jax.random.normal(k3, (B, H, Lk, d_v), dtype=jnp.float32)

    ctx_ref, attn_ref = _reference(Q, K, V, d_k)

    context, attn = scaled_dot_product_attention(Q, K, V, d_k,
                                                 use_bf16_matmul=False)
    jax.block_until_ready((context, attn))
    assert jnp.allclose(context, ctx_ref, atol=1e-4, rtol=1e-4)
    assert jnp.allclose(attn, attn_ref, atol=1e-4, rtol=1e-4)
    # Exact normalize: returned attention rows sum to 1.
    assert jnp.allclose(jnp.sum(attn, axis=-1), 1.0, atol=1e-5)

    # --- Test 1b: same path with bf16 MXU operands (default fast path) ---
    context_b, attn_b = scaled_dot_product_attention(Q, K, V, d_k)
    jax.block_until_ready((context_b, attn_b))
    assert jnp.allclose(context_b, ctx_ref, atol=2e-2, rtol=2e-2)
    assert jnp.allclose(attn_b, attn_ref, atol=2e-2, rtol=2e-2)

    # --- Test 2: flash path (context only), tiled over Lq and Lk ---
    B2, H2, L2, D2 = 2, 2, 512, 64
    Q2 = jax.random.normal(k4, (B2, H2, L2, D2), dtype=jnp.float32)
    K2 = jax.random.normal(k5, (B2, H2, L2, D2), dtype=jnp.float32)
    V2 = jax.random.normal(k6, (B2, H2, L2, D2), dtype=jnp.float32)

    context2 = scaled_dot_product_attention(
        Q2, K2, V2, D2, return_attn=False, q_tile=128, k_tile=128)
    jax.block_until_ready(context2)

    ctx2_ref, _ = _reference(Q2, K2, V2, D2)
    assert jnp.allclose(context2, ctx2_ref, atol=5e-3, rtol=5e-3)

    print("KERNEL_OK")
</pallas_src>

<mosaic_0001>
module attributes {stable_mosaic.version = 11 : i64} {
  func.func @_sdpa_attn_kernel(%arg0: i32, %arg1: i32, %arg2: i32, %arg3: memref<1x1x8x32xf32, #tpu.memory_space<vmem>>, %arg4: memref<1x1x8x32xf32, #tpu.memory_space<vmem>>, %arg5: memref<1x1x8x32xf32, #tpu.memory_space<vmem>>, %arg6: memref<1x1x8x32xf32, #tpu.memory_space<vmem>>, %arg7: memref<1x1x8x8xf32, #tpu.memory_space<vmem>>) attributes {dimension_semantics = [#tpu.dimension_semantics<parallel>, #tpu.dimension_semantics<parallel>, #tpu.dimension_semantics<parallel>], iteration_bounds = array<i64: 2, 4, 1>, scalar_prefetch = 0 : i64, scratch_operands = 0 : i64, tpu.core_type = #tpu.core_type<tc>, window_params = [{transform_indices = @transform_0, window_bounds = array<i64: 1, 1, 8, 32>}, {transform_indices = @transform_1, window_bounds = array<i64: 1, 1, 8, 32>}, {transform_indices = @transform_2, window_bounds = array<i64: 1, 1, 8, 32>}, {transform_indices = @transform_3, window_bounds = array<i64: 1, 1, 8, 32>}, {transform_indices = @transform_4, window_bounds = array<i64: 1, 1, 8, 8>}]} {
    %c0 = arith.constant 0 : index
    %c0_0 = arith.constant 0 : index
    %c0_1 = arith.constant 0 : index
    %c0_2 = arith.constant 0 : index
    %0 = vector.load %arg3[%c0, %c0_0, %c0_1, %c0_2] : memref<1x1x8x32xf32, #tpu.memory_space<vmem>>, vector<1x1x8x32xf32>
    %1 = vector.shape_cast %0 : vector<1x1x8x32xf32> to vector<8x32xf32>
    %c0_3 = arith.constant 0 : index
    %c0_4 = arith.constant 0 : index
    %c0_5 = arith.constant 0 : index
    %c0_6 = arith.constant 0 : index
    %2 = vector.load %arg4[%c0_3, %c0_4, %c0_5, %c0_6] : memref<1x1x8x32xf32, #tpu.memory_space<vmem>>, vector<1x1x8x32xf32>
    %3 = vector.shape_cast %2 : vector<1x1x8x32xf32> to vector<8x32xf32>
    %c0_7 = arith.constant 0 : index
    %c0_8 = arith.constant 0 : index
    %c0_9 = arith.constant 0 : index
    %c0_10 = arith.constant 0 : index
    %4 = vector.load %arg5[%c0_7, %c0_8, %c0_9, %c0_10] : memref<1x1x8x32xf32, #tpu.memory_space<vmem>>, vector<1x1x8x32xf32>
    %5 = vector.shape_cast %4 : vector<1x1x8x32xf32> to vector<8x32xf32>
    %cst = arith.constant 0.176776692 : f32
    %6 = vector.broadcast %cst : f32 to vector<8x32xf32>
    %7 = arith.mulf %1, %6 : vector<8x32xf32>
    %cst_11 = arith.constant dense<0.000000e+00> : vector<8x8xf32>
    %8 = tpu.matmul %7, %3, %cst_11 {dimension_numbers = #tpu.dot_dimension_numbers<[1], [1], [0], [0], [0, 0, 1, 0], [], []>} : vector<8x32xf32>, vector<8x32xf32>, vector<8x8xf32> -> vector<8x8xf32>
    %cst_12 = arith.constant dense<0xFF800000> : vector<8xf32>
    %9 = vector.multi_reduction <maximumf>, %8, %cst_12 [1] : vector<8x8xf32> to vector<8xf32>
    %10 = vector.shape_cast %9 : vector<8xf32> to vector<8x1xf32>
    %11 = vector.broadcast %10 : vector<8x1xf32> to vector<8x8xf32>
    %12 = arith.subf %8, %11 : vector<8x8xf32>
    %13 = math.exp %12 : vector<8x8xf32>
    %cst_13 = arith.constant dense<0.000000e+00> : vector<8xf32>
    %14 = vector.multi_reduction <add>, %13, %cst_13 [1] : vector<8x8xf32> to vector<8xf32>
    %15 = vector.shape_cast %14 : vector<8xf32> to vector<8x1xf32>
    %16 = vector.broadcast %15 : vector<8x1xf32> to vector<8x8xf32>
    %17 = arith.divf %13, %16 : vector<8x8xf32>
    %cst_14 = arith.constant dense<0.000000e+00> : vector<8x32xf32>
    %18 = tpu.matmul %17, %5, %cst_14 {dimension_numbers = #tpu.dot_dimension_numbers<[1], [0], [0], [1], [0, 0, 1, 1], [], []>} : vector<8x8xf32>, vector<8x32xf32>, vector<8x32xf32> -> vector<8x32xf32>
    %c0_15 = arith.constant 0 : index
    %c0_16 = arith.constant 0 : index
    %c0_17 = arith.constant 0 : index
    %c0_18 = arith.constant 0 : index
    %19 = vector.load %arg6[%c0_15, %c0_16, %c0_17, %c0_18] : memref<1x1x8x32xf32, #tpu.memory_space<vmem>>, vector<1x1x8x32xf32>
    %20 = vector.shape_cast %19 : vector<1x1x8x32xf32> to vector<8x32xf32>
    %21 = vector.shape_cast %18 : vector<8x32xf32> to vector<1x1x8x32xf32>
    tpu.vector_store %arg6[%c0_15, %c0_16, %c0_17, %c0_18], %21 {strides = array<i32>} : memref<1x1x8x32xf32, #tpu.memory_space<vmem>>, vector<1x1x8x32xf32>,
    %c0_19 = arith.constant 0 : index
    %c0_20 = arith.constant 0 : index
    %c0_21 = arith.constant 0 : index
    %c0_22 = arith.constant 0 : index
    %22 = vector.load %arg7[%c0_19, %c0_20, %c0_21, %c0_22] : memref<1x1x8x8xf32, #tpu.memory_space<vmem>>, vector<1x1x8x8xf32>
    %23 = vector.shape_cast %22 : vector<1x1x8x8xf32> to vector<8x8xf32>
    %24 = vector.shape_cast %17 : vector<8x8xf32> to vector<1x1x8x8xf32>
    tpu.vector_store %arg7[%c0_19, %c0_20, %c0_21, %c0_22], %24 {strides = array<i32>} : memref<1x1x8x8xf32, #tpu.memory_space<vmem>>, vector<1x1x8x8xf32>,
    return
  }
  func.func @transform_0(%arg0: i32, %arg1: i32, %arg2: i32) -> (i32, i32, i32, i32) {
    %c0_i32 = arith.constant 0 : i32
    %c0_i32_0 = arith.constant 0 : i32
    return %arg0, %arg1, %arg2, %c0_i32 : i32, i32, i32, i32
  }
  func.func @transform_1(%arg0: i32, %arg1: i32, %arg2: i32) -> (i32, i32, i32, i32) {
    %c0_i32 = arith.constant 0 : i32
    %c0_i32_0 = arith.constant 0 : i32
    %c0_i32_1 = arith.constant 0 : i32
    return %arg0, %arg1, %c0_i32, %c0_i32_0 : i32, i32, i32, i32
  }
  func.func @transform_2(%arg0: i32, %arg1: i32, %arg2: i32) -> (i32, i32, i32, i32) {
    %c0_i32 = arith.constant 0 : i32
    %c0_i32_0 = arith.constant 0 : i32
    %c0_i32_1 = arith.constant 0 : i32
    return %arg0, %arg1, %c0_i32, %c0_i32_0 : i32, i32, i32, i32
  }
  func.func @transform_3(%arg0: i32, %arg1: i32, %arg2: i32) -> (i32, i32, i32, i32) {
    %c0_i32 = arith.constant 0 : i32
    %c0_i32_0 = arith.constant 0 : i32
    return %arg0, %arg1, %arg2, %c0_i32 : i32, i32, i32, i32
  }
  func.func @transform_4(%arg0: i32, %arg1: i32, %arg2: i32) -> (i32, i32, i32, i32) {
    %c0_i32 = arith.constant 0 : i32
    %c0_i32_0 = arith.constant 0 : i32
    return %arg0, %arg1, %arg2, %c0_i32 : i32, i32, i32, i32
  }
}

</mosaic_0001>

<bundles_post_ra>
// kernel: tpu_custom_call.1
= control target key start
LH: loop header
LB: loop body
LE: loop exit
PB: predicated region body
PF: predicated region fallthrough
CT: control target
= control target key end

     0   :  { %s1440_s0 = inlined_call_operand.hbm [shape: f32[2,4,8,32], index: 0, kind: input, shape index: {}]   ;;  %s1441_s1 = inlined_call_operand.hbm [shape: f32[2,4,8,32], index: 1, kind: input, shape index: {}]   ;;  %s1442_s2 = inlined_call_operand.hbm [shape: f32[2,4,8,32], index: 2, kind: input, shape index: {}]   ;;  %s1443_s3 = inlined_call_operand.hbm [shape: f32[2,4,8,32], index: 3, kind: output, shape index: {0}]   ;;  %s1444_s4 = inlined_call_operand.hbm [shape: f32[2,4,8,8], index: 4, kind: output, shape index: {1}]  }
   0x1   :  { %1455 = sst [smem:[#allocation22_spill]] %s1441_s1 }
   0x2   :  { %10 = vsyncpa [#allocation3], 0 }
   0x3   :  { %12 = vsyncpa [#allocation3 + $0x1], 0 }
   0x4   :  { %13 = vsyncpa [#allocation6], 0 }
   0x5   :  { %15 = vsyncpa [#allocation6 + $0x1], 0 }
   0x6   :  { %16 = vsyncpa [#allocation4], 0 }
   0x7   :  { %18 = vsyncpa [#allocation4 + $0x1], 0 }
   0x8   :  { %19 = vsyncpa [#allocation10], 0 }
   0x9   :  { %21 = vsyncpa [#allocation10 + $0x1], 0  ;;  %s1116_s15 = smov 0   ;;  %s1118_s16 = smov 0  }
   0xa   :  { %s1120_s17 = smov 0   ;;  %s1122_s18 = smov 0  }
   0xb   :  { %s1124_s19 = smov 0   ;;  %s1126_s20 = smov 0  }
   0xc   :  { %s1128_s21 = smov 0   ;;  %s1130_s22 = smov 0  }
   0xd LB: > { %1456 = sst [smem:[#allocation15_spill]] %s1054_s15  ;;  %s1157_s23 = sadd.s32 4294967295, %s1082_s22   ;;  %s1082_s22 = sphi %s1130_s22, %s27_s22   ;;  %s1078_s21 = sphi %s1128_s21, %s1485_s21   ;;  %s1074_s20 = sphi %s1126_s20, %s1484_s20   ;;  %s1070_s19 = sphi %s1124_s19, %s1483_s19   ;;  %s1066_s18 = sphi %s1122_s18, %s1482_s18   ;;  %s1062_s17 = sphi %s1120_s17, %s1488_s17   ;;  %s1058_s16 = sphi %s1118_s16, %s1487_s16   ;;  %s1054_s15 = sphi %s1116_s15, %s1486_s15  }
   0xe   : > { %1457 = sst [smem:[#allocation16_spill]] %s1074_s20  ;;  %s716_s24 = sadd.s32 4294967294, %s1082_s22  }
   0xf   : > { %1458 = sst [smem:[#allocation17_spill]] %s1078_s21  ;;  %s42_s25 = sadd.s32 1, %s1074_s20 }
  0x10   : > { %s46_s26 = sadd.s32 1, %s1078_s21  ;;  %p44_p0 = scmp.ge.s32.totalorder %s42_s25, 4 }
  0x11   : > { %s57_s27 = sadd.s32 1, %s1062_s17  ;;  %p64_p1 = scmp.ne.s32.totalorder %s1062_s17, %s1058_s16 }
  0x12   : > { %p65_p2 = scmp.eq.s32.totalorder %s1082_s22, 0  ;;  %s1490_s25 = smov (%p44_p0, %s42_s25), 0 }
  0x13   : > { %1459 = sst [smem:[#allocation18_spill]] %s1490_s25  ;;  %s1492_s26 = smov (!%p44_p0, %s46_s26), %s1078_s21 }
  0x14   : > { %s51_s28 = ssub.s32 %s1074_s20, %s1490_s25  ;;  %p1171_p3 = por %p65_p2, %p64_p1 }
  0x15   : > { %p48_p4 = scmp.ge.s32.totalorder %s1492_s26, 2  ;;  %p70_p5 = scmp.ne.s32.totalorder %s1058_s16, %s1054_s15 }
  0x16   : > { %p71_p6 = scmp.eq.s32.totalorder %s1157_s23, 0  ;;  %p154_p7 = scmp.eq.s32.totalorder %s1157_s23, 7 }
  0x17   : > { %s1494_s26 = smov (%p48_p4, %s1492_s26), 0  ;;  %p160_p10 = scmp.eq.s32.totalorder %s716_s24, 7 }
  0x18   : > { %1461 = sst [smem:[#allocation19_spill]] %s1494_s26  ;;  %p1181_p8 = por %p71_p6, %p70_p5 }
  0x19   : > { %p1185_p9 = por %p154_p7, %p64_p1  ;;  %s50_s6 = ssub.s32 %s1078_s21, %s1494_s26 }
  0x1a   : > { %s1462_s30 = scalar_select %p1181_p8, 1, 0 }
  0x1b   : > { %s1463_s5 = scalar_select %p1185_p9, 1, 0 }
  0x1c   : > { %s52_s7 = sor.u32 %s51_s28, %s50_s6  ;;  %p1191_p12 = por %p160_p10, %p70_p5 }
  0x1d   : > { %p55_p11 = scmp.eq.s32.totalorder %s52_s7, 0  ;;  %p786_p13 = scmp.lt.s32.totalorder %s1082_s22, 8 }
  0x1e   : > { %s1464_s8 = scalar_select %p1191_p12, 1, 0 }
  0x1f   : > { %s1445_s9 = sand.u32 1, %s1062_s17   ;;  %s720_s12 = sshll.u32 %s1078_s21, 2 }
  0x20   : > { %1465 = sst [smem:[#allocation20_spill]] %s1464_s8  ;;  %s1202_s11 = sshll.u32 %s1445_s9, 3 }
  0x21   : > { %s1198_s10 = scalar_select %p55_p11, %s1062_s17, %s57_s27  }
  0x22   : > { %s220_s13 = sadd.s32 %s1074_s20, %s720_s12  ;;  %p1208_p0 = pnand %p786_p13, %p1171_p3 }
  0x23   : > { %1466 = sst [smem:[#allocation21_spill]] %s1198_s10  ;;  %s1212_s24 = sshll.u32 %s220_s13, 7 }
  0x24   : > { %s1467_s14 = scalar_select %p1208_p0, 1, 0 }
  0x25   : > { %s231_s28 = sand.u32 1, %s1082_s22   ;;  %s1468_s1 = sld [smem:[#allocation22_spill]] }
  0x26   : > { %s235_s12 = scalar_lea.vmem [#allocation5], %s1202_s11  ;;  %s1226_s9 = scalar_lea.sflag [#allocation6], %s231_s28 }
  0x27   : > { %s244_s29 = sshll.u32 %s235_s12, 4  ;;  %p1232_p4 = pneg %p1208_p0  ;;  %s1223_s29 = int_to_ptr.vmem [resolvable:$true] %s244_s29 }
  0x2b   : > { %s1219_s27 = scalar_lea.hbm %s1468_s1, %s1212_s24  ;;  %s863_s12 = scalar_lea.hbm %s1468_s1, 1024 }
  0x2c   : > { %s858_s13 = scalar_lea.hbm %s1219_s27, 128  ;;  %p864_p7 = scmp.lt.u32.totalorder %s1219_s27, %s1468_s1 }
  0x2d   : > { %p859_p3 = scmp.ne.s32.totalorder %s1219_s27, %s858_s13  ;;  %p865_p10 = scmp.lt.u32.totalorder %s863_s12, %s858_s13 }
  0x2e   : > { %p867_p13 = scmp.lt.u32.totalorder %s858_s13, %s1219_s27 }
  0x2f   : > { %p861_p5 = pnand %p1232_p4, %p859_p3  ;;  %p866_p11 = por %p865_p10, %p864_p7 }
  0x31   : > { %p862_p6 = pneg %p861_p5  ;;  %p868_p1 = por %p867_p13, %p866_p11 }
  0x33   : > { %p869_p2 = pnand %p868_p1, %p862_p6 }
  0x35   : > { %872 = shalt.err (!%p869_p2)
}
  0x36   : > { %s873_s28 = scalar_lea.vmem %s1223_s29, 128  ;;  %s1084_s6 = smov [#allocation5]  }
  0x37   : > { %p874_p3 = scmp.ne.s32.totalorder %s1223_s29, %s873_s28  ;;  %s878_s7 = sshll.u32 %s1084_s6, 4  ;;  %s879_s7 = int_to_ptr.vmem [resolvable:$false] %s878_s7 }
  0x38   : > { %s880_s21 = scalar_lea.vmem %s879_s7, 256  ;;  %p881_p9 = scmp.lt.s32.totalorder %s1223_s29, %s879_s7 }
  0x39   : > { %p876_p5 = pnand %p874_p3, %p1232_p4  ;;  %p882_p8 = scmp.lt.s32.totalorder %s880_s21, %s873_s28 }
  0x3b   : > { %p877_p12 = pneg %p876_p5  ;;  %p883_p7 = por %p882_p8, %p881_p9 }
  0x3d   : > { %p884_p10 = pnand %p883_p7, %p877_p12 }
  0x3f   : > { %887 = shalt.err (!%p884_p10)
}
  0x40   : > { %775 = dma.hbm_to_vmem [thread:$0]  (!%p1208_p0), %s1219_s27, 128, %s1223_s29, %s1226_s9  }
  0x41   : > { %p1470_p1 = scmp.lt.s32.totalorder %s1082_s22, 9  ;;  %p1471_p2 = scmp.ge.s32.totalorder %s1082_s22, 1 }
  0x42   : > { %s1268_s28 = scalar_lea.hbm %s1440_s0, %s1212_s24  ;;  %s214_s6 = scalar_lea.vmem [#allocation2], %s1202_s11 }
  0x43   : > { %p1260_p6 = pnand %p1471_p2, %p1470_p1  ;;  %s224_s7 = sshll.u32 %s214_s6, 4  ;;  %s1271_s7 = int_to_ptr.vmem [resolvable:$true] %s224_s7 }
  0x44   : > { %s1277_s21 = scalar_lea.hbm %s1442_s2, %s1212_s24  ;;  %s1473_s1 = sand.u32 1, %s1062_s17  }
  0x45   : > { %s1472_s25 = scalar_select %p1260_p6, 1, 0 }
  0x46   : > { %s211_s20 = scalar_lea.sflag [#allocation3], %s1473_s1  ;;  %s888_s10 = scalar_lea.hbm %s1268_s28, 128 }
  0x47   : > { %p889_p8 = scmp.ne.s32.totalorder %s1268_s28, %s888_s10  ;;  %s893_s8 = scalar_lea.hbm %s1440_s0, 1024 }
  0x48   : > { %p894_p11 = scmp.lt.u32.totalorder %s1268_s28, %s1440_s0  ;;  %p895_p13 = scmp.lt.u32.totalorder %s893_s8, %s888_s10 }
  0x49   : > { %p891_p9 = pnand %p889_p8, %p1232_p4  ;;  %p897_p5 = scmp.lt.u32.totalorder %s888_s10, %s1268_s28 }
  0x4a   : > { %p896_p3 = por %p895_p13, %p894_p11 }
  0x4b   : > { %p892_p12 = pneg %p891_p9 }
  0x4c   : > { %p898_p7 = por %p897_p5, %p896_p3 }
  0x4e   : > { %p899_p10 = pnand %p898_p7, %p892_p12 }
  0x50   : > { %902 = shalt.err (!%p899_p10)
}
  0x51   : > { %s903_s1 = scalar_lea.vmem %s1271_s7, 128  ;;  %s1085_s24 = smov [#allocation2]  }
  0x52   : > { %p904_p1 = scmp.ne.s32.totalorder %s1271_s7, %s903_s1  ;;  %s908_s27 = sshll.u32 %s1085_s24, 4  ;;  %s909_s27 = int_to_ptr.vmem [resolvable:$false] %s908_s27 }
  0x53   : > { %s910_s15 = scalar_lea.vmem %s909_s27, 256  ;;  %p911_p9 = scmp.lt.s32.totalorder %s1271_s7, %s909_s27 }
  0x54   : > { %p906_p2 = pnand %p904_p1, %p1232_p4  ;;  %p912_p6 = scmp.lt.s32.totalorder %s910_s15, %s903_s1 }
  0x56   : > { %p907_p8 = pneg %p906_p2  ;;  %p913_p11 = por %p912_p6, %p911_p9 }
  0x58   : > { %p914_p13 = pnand %p913_p11, %p907_p8 }
  0x5a   : > { %917 = shalt.err (!%p914_p13)
}
  0x5b   : > { %772 = dma.hbm_to_vmem [thread:$0]  (!%p1208_p0), %s1268_s28, 128, %s1271_s7, %s211_s20  }
  0x5c   : > { %s255_s8 = scalar_lea.vmem [#allocation7], %s1202_s11  ;;  %s918_s29 = scalar_lea.hbm %s1277_s21, 128 }
  0x5d   : > { %s264_s10 = sshll.u32 %s255_s8, 4  ;;  %p919_p12 = scmp.ne.s32.totalorder %s1277_s21, %s918_s29  ;;  %s265_s10 = int_to_ptr.vmem [resolvable:$true] %s264_s10 }
  0x5e   : > { %s923_s6 = scalar_lea.hbm %s1442_s2, 1024  ;;  %p924_p5 = scmp.lt.u32.totalorder %s1277_s21, %s1442_s2 }
  0x5f   : > { %p921_p6 = pnand %p919_p12, %p1232_p4  ;;  %p925_p7 = scmp.lt.u32.totalorder %s923_s6, %s918_s29 }
  0x60   : > { %p927_p1 = scmp.lt.u32.totalorder %s918_s29, %s1277_s21 }
  0x61   : > { %p922_p3 = pneg %p921_p6  ;;  %p926_p10 = por %p925_p7, %p924_p5 }
  0x63   : > { %p928_p2 = por %p927_p1, %p926_p10 }
  0x65   : > { %p929_p8 = pnand %p928_p2, %p922_p3 }
  0x67   : > { %932 = shalt.err (!%p929_p8)
}
  0x68   : > { %s933_s20 = scalar_lea.vmem %s265_s10, 128  ;;  %s1086_s11 = smov [#allocation7]  }
  0x69   : > { %p934_p9 = scmp.ne.s32.totalorder %s265_s10, %s933_s20  ;;  %s938_s28 = sshll.u32 %s1086_s11, 4  ;;  %s939_s28 = int_to_ptr.vmem [resolvable:$false] %s938_s28 }
  0x6a   : > { %s940_s7 = scalar_lea.vmem %s939_s28, 256  ;;  %p941_p12 = scmp.lt.s32.totalorder %s265_s10, %s939_s28 }
  0x6b   : > { %p936_p11 = pnand %p934_p9, %p1232_p4  ;;  %p942_p6 = scmp.lt.s32.totalorder %s940_s7, %s933_s20 }
  0x6d   : > { %p937_p13 = pneg %p936_p11  ;;  %p943_p0 = por %p942_p6, %p941_p12 }
  0x6f   : > { %p944_p5 = pnand %p943_p0, %p937_p13 }
  0x71   : > { %947 = shalt.err (!%p944_p5)
}
  0x72   : > { %p1474_p7 = scmp.ne.s32.totalorder %s1467_s14, 0  ;;  %p1475_p3 = scmp.ne.s32.totalorder %s1472_s25, 0 }
  0x73   : > { %s1324_s26 = sand.u32 (!%p1475_p3), 1, %s1058_s16   ;;  %p1476_p0 = scmp.ne.s32.totalorder (!%p1475_p3), %s1462_s30, 0 }
  0x74   : > { %778 = dma.hbm_to_vmem [thread:$0]  (!%p1474_p7), %s1277_s21, 128, %s265_s10, %s1226_s9  }
  0x75   : > { %273 = sbr.rel (%p1475_p3) target bundleno = 886 (0x376), region = 32  ;;  %s1327_s27 = sshll.u32 (!%p1475_p3), %s1324_s26, 3 }
  0x76   : > { %s276_s15 = scalar_lea.sflag (!%p1475_p3), [#allocation3], %s1324_s26  ;;  %s279_s8 = scalar_lea.vmem (!%p1475_p3), [#allocation2], %s1327_s27 }
  0x7c   : > { %1037 = dma.done.wait (%p1476_p0), %s276_s15, 128  }
  0x7d   : > { %1039 = vsyncadd (%p1476_p0), %s276_s15, 4294967168  ;;  %s284_s9 = sand.u32 1, %s1157_s23   ;;  %s288_s25 = scalar_lea.vmem [#allocation5], %s1327_s27 }
  0x7e   : > { %s285_s14 = scalar_lea.sflag [#allocation6], %s284_s9 }
  0x7f   : > { %1041 = dma.done.wait (%p1476_p0), %s285_s14, 256  }
  0x80   : > { %1043 = vsyncadd (%p1476_p0), %s285_s14, 4294967040  ;;  %v1087_v0 = vmov 0.0   ;;  %vm1088_vm0 = vmmov 0   ;;  %vm341_vm1 = vcmask 261120   ;;  %v338_v1 = vld [vmem:[%s288_s25] sm:$0xff]  ;;  %v337_v2 = vld [vmem:[%s279_s8] sm:$0xff] }
  0x81   : > { %749 = vmatprep.subr.mxu0 %v1087_v0  ;;  %751 = vmatprep.mubr.msk.f32.mxu0 %vm1088_vm0, %v1087_v0  ;;  %v340_v3 = vmul.f32 0.17677669, %v337_v2  ;;  %vm418_vm2 = vcmask 64512   ;;  %s297_s23 = scalar_lea.vmem [#allocation7], %s1327_s27  ;;  %s336_s30 = scalar_lea.vmem [#allocation9], %s1327_s27 }
  0x82   : > { %754 = vmatprep.subr.mxu1 %v1087_v0  ;;  %756 = vmatprep.mubr.msk.f32.mxu1 %vm1088_vm0, %v1087_v0  ;;  %v339_v12 = vld [vmem:[%s297_s23] sm:$0xff]  ;;  %s739_s21 = sshll.u32 %s1070_s19, 2  ;;  %s543_s1 = sshll.u32 %s336_s30, 4  ;;  %s544_s1 = int_to_ptr.vmem [resolvable:$true] %s543_s1 }
  0x83   : > { %750 = vmatpush3.xpose.msk.msra.mxu0 %vm341_vm1, %v338_v1  ;;  %755 = vmatpush3.msra.mxu1 %v339_v12  ;;  %s1351_s10 = sadd.s32 %s1066_s18, %s739_s21  ;;  %s511_s24 = scalar_lea.sflag [#allocation10], %s1324_s26 }
  0x84   : > { %s740_s29 = sshll.u32 %s1351_s10, 7  ;;  %s948_s20 = scalar_lea.vmem %s544_s1, 128 }
  0x85   : > { %s1359_s6 = scalar_lea.hbm %s1444_s4, %s740_s29  ;;  %p949_p4 = scmp.ne.s32.totalorder %s544_s1, %s948_s20 }
  0x86   : > { %752 = vmatmul.mubr.msk.f32.vlgmr.msra.gmra.mrb[0].mxu0 %vm341_vm1, %v340_v3  ;;  %p1477_p10 = scmp.ne.s32.totalorder %s1463_s5, 0  ;;  %s1089_s19 = smov [#allocation9]  }
  0x87   : > { %s952_s18 = sshll.u32 %s1089_s19, 4  ;;  %s953_s18 = int_to_ptr.vmem [resolvable:$false] %s952_s18 }
  0x88   : > { %p950_p1 = pnand %p949_p4, %p1477_p10  ;;  %s954_s11 = scalar_lea.vmem %s953_s18, 256 }
  0x89   : > { %p955_p8 = scmp.lt.s32.totalorder %s544_s1, %s953_s18  ;;  %p956_p9 = scmp.lt.s32.totalorder %s954_s11, %s948_s20 }
  0x8a   : > { %p951_p2 = pneg %p950_p1 }
  0x8b   : > { %p957_p11 = por %p956_p9, %p955_p8 }
  0x8d   : > { %p958_p13 = pnand %p957_p11, %p951_p2 }
 0x159   : > { %v414_v4 = vpop.f32.mrb[0].mxu0 }
 0x15a   : > { %v753_v5 = vpop.f32.mrb[1].mxu0  ;;  %v419_v6 = vsel %vm418_vm2, %v414_v4, -inf }
 0x15b   : > { %420 = vmax.xlane.f32.xlu0 %v419_v6 }
 0x1e8   : > { %v421_v7 = vpop.xlane.xlu0 %420 }
 0x1e9   : > { %v422_v8 = vsub.f32 %v414_v4, %v421_v7 }
 0x1eb   : > { %v423_v9 = vmul.f32 1.442695, %v422_v8 }
 0x1ed   : > { %854 = vpow2.f32 %v423_v9 }
 0x1f7   : > { %v855_v10 = vpop.eup %854 }
 0x1f8   : > { %v425_v11 = vsel %vm418_vm2, %v855_v10, 0.0 }
 0x1f9   : > { %426 = vadd.xlane.f32.xlu0 %v425_v11 }
 0x286   : > { %v427_v13 = vpop.xlane.xlu0 %426 }
 0x287   : > { %856 = vrcp.f32 %v427_v13 }
 0x291   : > { %v857_v14 = vpop.eup %856 }
 0x292   : > { %v429_v15 = vmul.f32 %v857_v14, %v855_v10 }
 0x294   : > { %757 = vmatmul.mubr.msk.f32.vlgmr.msra.gmra.mrb[0].mxu1 %vm418_vm2, %v429_v15  ;;  %504 = vst.msk [vmem:[%s336_s30] sm:$0xff] %vm418_vm2, %v429_v15 }
 0x295   : > { %961 = shalt.err (!%p958_p13)
}
 0x296   : > { %s962_s28 = scalar_lea.hbm %s1359_s6, 128  ;;  %s966_s8 = scalar_lea.hbm %s1444_s4, 1024 }
 0x297   : > { %p963_p12 = scmp.ne.s32.totalorder %s1359_s6, %s962_s28  ;;  %p967_p7 = scmp.lt.u32.totalorder %s1359_s6, %s1444_s4 }
 0x298   : > { %p968_p3 = scmp.lt.u32.totalorder %s966_s8, %s962_s28  ;;  %p970_p4 = scmp.lt.u32.totalorder %s962_s28, %s1359_s6 }
 0x299   : > { %p964_p6 = pnand %p963_p12, %p1477_p10 }
 0x29a   : > { %p969_p0 = por %p968_p3, %p967_p7 }
 0x29b   : > { %p965_p5 = pneg %p964_p6 }
 0x29c   : > { %p971_p1 = por %p970_p4, %p969_p0 }
 0x29e   : > { %p972_p2 = pnand %p971_p1, %p965_p5 }
 0x2a0   : > { %975 = shalt.err (!%p972_p2)
}
 0x2a1   : > { %766 = dma.vmem_to_hbm [thread:$0]  (%p1477_p10), %s544_s1, 128, %s1359_s6, %s511_s24  }
 0x2a2   : > { %s329_s25 = scalar_lea.vmem [#allocation8], %s1327_s27  ;;  %s1385_s13 = scalar_lea.hbm %s1443_s3, %s740_s29 }
 0x2a3   : > { %s527_s23 = sshll.u32 %s329_s25, 4  ;;  %s506_s12 = scalar_lea.sflag [#allocation4], %s1324_s26  ;;  %s1387_s23 = int_to_ptr.vmem [resolvable:$true] %s527_s23 }
 0x2a4   : > { %s976_s20 = scalar_lea.vmem %s1387_s23, 128  ;;  %s1090_s27 = smov [#allocation8]  }
 0x2a5   : > { %p977_p8 = scmp.ne.s32.totalorder %s1387_s23, %s976_s20  ;;  %s980_s10 = sshll.u32 %s1090_s27, 4  ;;  %s981_s10 = int_to_ptr.vmem [resolvable:$false] %s980_s10 }
 0x2a6   : > { %s982_s29 = scalar_lea.vmem %s981_s10, 256  ;;  %p983_p13 = scmp.lt.s32.totalorder %s1387_s23, %s981_s10 }
 0x2a7   : > { %p978_p9 = pnand %p977_p8, %p1477_p10  ;;  %p984_p12 = scmp.lt.s32.totalorder %s982_s29, %s976_s20 }
 0x2a9   : > { %p979_p11 = pneg %p978_p9  ;;  %p985_p6 = por %p984_p12, %p983_p13 }
 0x2ab   : > { %p986_p5 = pnand %p985_p6, %p979_p11 }
 0x367   : > { %v499_v16 = vpop.f32.mrb[0].mxu1 }
 0x368   : > { %503 = vst.msk [vmem:[%s329_s25] sm:$0xff] %vm341_vm1, %v499_v16  ;;  %v758_v17 = vpop.f32.mrb[1].mxu1 }
 0x369   : > { %989 = shalt.err (!%p986_p5)
}
 0x36a   : > { %s990_s26 = scalar_lea.hbm %s1385_s13, 128  ;;  %s994_s24 = scalar_lea.hbm %s1443_s3, 1024 }
 0x36b   : > { %p991_p7 = scmp.ne.s32.totalorder %s1385_s13, %s990_s26  ;;  %p995_p4 = scmp.lt.u32.totalorder %s1385_s13, %s1443_s3 }
 0x36c   : > { %p996_p1 = scmp.lt.u32.totalorder %s994_s24, %s990_s26  ;;  %p998_p8 = scmp.lt.u32.totalorder %s990_s26, %s1385_s13 }
 0x36d   : > { %p992_p3 = pnand %p991_p7, %p1477_p10 }
 0x36e   : > { %p997_p2 = por %p996_p1, %p995_p4 }
 0x36f   : > { %p993_p0 = pneg %p992_p3 }
 0x370   : > { %p999_p9 = por %p998_p8, %p997_p2 }
 0x372   : > { %p1000_p11 = pnand %p999_p9, %p993_p0 }
 0x374   : > { %1003 = shalt.err (!%p1000_p11)
}
 0x375   : > { %765 = dma.vmem_to_hbm [thread:$0]  (%p1477_p10), %s1387_s23, 128, %s1385_s13, %s506_s12  }
 0x376 PF: > { %s1478_s11 = sld [smem:[#allocation15_spill]]  ;;  %s1479_s28 = sld [smem:[#allocation20_spill]] }
 0x377   : > { %p787_p13 = scmp.ge.s32.totalorder %s1082_s22, 2 }
 0x37c   : > { %s555_s7 = sand.u32 1, %s1478_s11   ;;  %p1480_p12 = scmp.ne.s32.totalorder %s1479_s28, 0 }
 0x37d   : > { %s556_s15 = scalar_lea.sflag [#allocation4], %s555_s7 }
 0x37e   : > { %p780_p6 = pnand %p787_p13, %p1480_p12 }
 0x380   : > { %1045 = dma.done.wait (!%p780_p6), %s556_s15, 128  }
 0x381   : > { %1047 = vsyncadd (!%p780_p6), %s556_s15, 4294967168  ;;  %s565_s8 = scalar_lea.sflag [#allocation10], %s555_s7 }
 0x382   : > { %1049 = dma.done.wait (!%p780_p6), %s565_s8, 128  }
 0x383   : > { %1051 = vsyncadd (!%p780_p6), %s565_s8, 4294967168  ;;  %s27_s22 = sadd.s32 1, %s1082_s22   ;;  %s1481_s5 = sld [smem:[#allocation21_spill]] }
 0x384   : > { %p24_p5 = scmp.ge.s32.totalorder %s27_s22, 10   ;;  %s1482_s18 = sld [smem:[#allocation16_spill]] }
 0x385   : > { %s1483_s19 = sld [smem:[#allocation17_spill]]  ;;  %s1484_s20 = sld [smem:[#allocation18_spill]] }
 0x386   : > { %s1485_s21 = sld [smem:[#allocation19_spill]]  ;;  %s1486_s15 = smov %s1058_s16 }
 0x387   : > { %s1487_s16 = smov %s1062_s17  ;;  %26 = sbr.rel (!%p24_p5) target bundleno = 13 (0xd), region = 118 }
 0x389   : > { %s1488_s17 = smov %s1481_s5 }
 0x38e   :  { %570 = vsyncpa [#allocation3], 1 }
 0x38f   :  { %572 = vsyncpa [#allocation3 + $0x1], 1 }
 0x390   :  { %573 = vsyncpa [#allocation6], 1 }
 0x391   :  { %575 = vsyncpa [#allocation6 + $0x1], 1 }
 0x392   :  { %576 = vsyncpa [#allocation4], 1 }
 0x393   :  { %578 = vsyncpa [#allocation4 + $0x1], 1 }
 0x394   :  { %579 = vsyncpa [#allocation10], 1 }
 0x395   :  { %581 = vsyncpa [#allocation10 + $0x1], 1 }

</bundles_post_ra>
